<compile_context>
chip_gen: v5e
topology: v5e:2x2
jax: 0.10.0
libtpu: 0.0.40
codegen_flags: <defaults>
</compile_context>

<pallas_src>
import math
import jax
import jax.numpy as jnp
from jax.experimental import pallas as pl
from jax.experimental.pallas import tpu as pltpu

LANE = 128     # TPU lane width
SUBLANE = 16   # batch-tile granularity (covers bf16 sublane packing; f32 needs 8)


def _round_up(x, m):
    return ((x + m - 1) // m) * m


def _pad2(a, rows, cols):
    r, c = a.shape
    return jnp.pad(a, ((0, rows - r), (0, cols - c)))


def mlp_kernel(x_ref, w1_ref, b1_ref, w2_ref, b2_ref, w3_ref, b3_ref, o_ref):
    # x arrives as f32 straight from HBM; downcast to bf16 here (no wrapper pass).
    x = x_ref[...].astype(jnp.bfloat16)                                   # (tm, K) bf16
    h = jnp.dot(x, w1_ref[...], preferred_element_type=jnp.float32) + b1_ref[...]
    h = jnp.maximum(h, 0.0).astype(jnp.bfloat16)                          # ReLU on f32 acc
    h = jnp.dot(h, w2_ref[...], preferred_element_type=jnp.float32) + b2_ref[...]
    h = jnp.maximum(h, 0.0).astype(jnp.bfloat16)                          # ReLU on f32 acc
    o = jnp.dot(h, w3_ref[...], preferred_element_type=jnp.float32) + b3_ref[...]
    o_ref[...] = o.astype(o_ref.dtype)                                    # (tm, 32) store
    # TODO(synk): dropout / layer_norm / spectral_norm / output_activation branches
    # of the PyTorch module are disabled by the default ctor args; not emitted here.


def init_linear_params(key, in_dim, out_dim):
    # Deterministic init mirroring torch.nn.Linear's U(-1/sqrt(fan_in), 1/sqrt(fan_in)).
    kw, kb = jax.random.split(key)
    bound = 1.0 / math.sqrt(in_dim)
    # Stored as (in_dim, out_dim) == W_torch.T
    w = jax.random.uniform(kw, (in_dim, out_dim), jnp.float32, -bound, bound)
    b = jax.random.uniform(kb, (1, out_dim), jnp.float32, -bound, bound)
    return w, b


def prepare_params(params):
    """One-time parameter prep (hoisted out of the per-call path).

    Hidden dims are lane-padded to multiples of 128 (exact: padded weight rows/cols
    and biases are zero, and ReLU preserves zeros). The input dim K and the output
    dim are NOT padded -- the kernel uses full-extent blocks for those. Weights are
    bf16 MXU operands; biases stay f32 (added on the f32 accumulator).
    """
    (w1, b1), (w2, b2), (w3, b3) = params
    in_dim = w1.shape[0]
    h1, h2, out_dim = w1.shape[1], w2.shape[1], w3.shape[1]
    h1p, h2p = _round_up(h1, LANE), _round_up(h2, LANE)

    w1p = _pad2(w1, in_dim, h1p).astype(jnp.bfloat16)
    w2p = _pad2(w2, h1p, h2p).astype(jnp.bfloat16)
    w3p = _pad2(w3, h2p, out_dim).astype(jnp.bfloat16)
    b1p = _pad2(b1, 1, h1p)
    b2p = _pad2(b2, 1, h2p)
    b3p = b3
    return (w1p, b1p, w2p, b2p, w3p, b3p)


def mlp_forward(x, prepared, *, tile_m=2048):
    w1p, b1p, w2p, b2p, w3p, b3p = prepared

    # Flatten trailing dims exactly like `x.view(x.size(0), -1)`
    if x.ndim > 2:
        x = x.reshape(x.shape[0], -1)
    B, in_dim = x.shape
    out_dim = w3p.shape[1]
    assert in_dim == w1p.shape[0], "input dim mismatch with prepared params"

    # Batch tile: large enough to amortize per-grid-step overhead, capped so big
    # batches still yield >=2 "parallel" steps (both v7x TCs get work), multiple
    # of 16 sublanes. Trailing partial tile is handled by the cdiv grid (writes
    # clipped; OOB input rows never reach a stored output row).
    tm = min(tile_m, _round_up(max(pl.cdiv(B, 2), 1), SUBLANE))
    tm = max(tm, SUBLANE)
    grid = (pl.cdiv(B, tm),)

    resident = lambda a: pl.BlockSpec(a.shape, lambda i: (0, 0))  # weights resident in VMEM

    # TODO(synk): if this MLP sits inside a larger model called repeatedly, keep
    # the weights resident across calls (cross-call futures / fusion) instead of
    # re-DMAing them per pallas_call; not applicable in this standalone script.
    out = pl.pallas_call(
        mlp_kernel,
        out_shape=jax.ShapeDtypeStruct((B, out_dim), jnp.float32),
        grid=grid,
        in_specs=[
            # x tiled over batch; last dim 64 == full array dim (no K pad needed).
            pl.BlockSpec((tm, in_dim), lambda i: (i, 0)),
            resident(w1p), resident(b1p),
            resident(w2p), resident(b2p),
            resident(w3p), resident(b3p),
        ],
        # out last dim 32 == full array dim: no lane-pad/slice round trip; the
        # masked partial stores are hidden under the HBM bound.
        out_specs=pl.BlockSpec((tm, out_dim), lambda i: (i, 0)),
        compiler_params=pltpu.CompilerParams(
            dimension_semantics=("parallel",)),   # shard batch tiles across TCs (v7x)
    )(x, w1p, b1p, w2p, b2p, w3p, b3p)
    return out


def _ref_bf16(x2d, params):
    """Plain-JAX replication of the kernel's bf16-operand / f32-accumulate math."""
    h = x2d.astype(jnp.bfloat16)
    for i, (w, b) in enumerate(params):
        h = jnp.dot(h, w.astype(jnp.bfloat16), preferred_element_type=jnp.float32) + b
        if i < len(params) - 1:
            h = jnp.maximum(h, 0.0).astype(jnp.bfloat16)
    return h


def _ref_f32(x2d, params):
    """Full-f32 math (the PyTorch module's semantics)."""
    h = x2d
    for i, (w, b) in enumerate(params):
        h = h @ w + b
        if i < len(params) - 1:
            h = jnp.maximum(h, 0.0)
    return h


if __name__ == "__main__":
    # Module config: input_dim=64 (flattened 4x4x4), hidden_dims=[128, 128], output_dim=32
    input_dim, output_dim = 64, 32
    hidden_dims = [128, 128]

    key = jax.random.PRNGKey(0)
    kx, kbig, k1, k2, k3 = jax.random.split(key, 5)

    params = [
        init_linear_params(k1, input_dim, hidden_dims[0]),
        init_linear_params(k2, hidden_dims[0], hidden_dims[1]),
        init_linear_params(k3, hidden_dims[1], output_dim),
    ]
    prepared = prepare_params(params)   # one-time pad + bf16 cast (hoisted)

    # --- Small-batch path (module-shaped input): (2, 4, 4, 4) -> flattened (2, 64)
    x = jax.random.normal(kx, (2, 4, 4, 4), jnp.float32)
    out = jax.block_until_ready(mlp_forward(x, prepared))
    assert out.shape == (2, output_dim)

    xr = x.reshape(x.shape[0], -1)
    assert jnp.allclose(out, _ref_bf16(xr, params), atol=2e-2, rtol=2e-2)
    assert jnp.allclose(out, _ref_f32(xr, params), atol=5e-2, rtol=5e-2)

    # --- Larger, non-tile-multiple batch: exercises the cdiv grid / clipped
    #     trailing partial tile with no batch-padded copy of x.
    x_big = jax.random.normal(kbig, (300, input_dim), jnp.float32)
    out_big = jax.block_until_ready(mlp_forward(x_big, prepared, tile_m=2048))
    assert out_big.shape == (300, output_dim)
    assert jnp.allclose(out_big, _ref_bf16(x_big, params), atol=2e-2, rtol=2e-2)
    assert jnp.allclose(out_big, _ref_f32(x_big, params), atol=5e-2, rtol=5e-2)

    print("KERNEL_OK")
</pallas_src>

<mosaic_0001>
module attributes {stable_mosaic.version = 11 : i64} {
  func.func @mlp_kernel(%arg0: i32, %arg1: memref<16x64xf32, #tpu.memory_space<vmem>>, %arg2: memref<64x128xbf16, #tpu.memory_space<vmem>>, %arg3: memref<1x128xf32, #tpu.memory_space<vmem>>, %arg4: memref<128x128xbf16, #tpu.memory_space<vmem>>, %arg5: memref<1x128xf32, #tpu.memory_space<vmem>>, %arg6: memref<128x32xbf16, #tpu.memory_space<vmem>>, %arg7: memref<1x32xf32, #tpu.memory_space<vmem>>, %arg8: memref<16x32xf32, #tpu.memory_space<vmem>>) attributes {dimension_semantics = [#tpu.dimension_semantics<parallel>], iteration_bounds = array<i64: 1>, scalar_prefetch = 0 : i64, scratch_operands = 0 : i64, tpu.core_type = #tpu.core_type<tc>, window_params = [{transform_indices = @transform_0, window_bounds = array<i64: 16, 64>}, {pipeline_mode = #tpu.pipeline_mode<synchronous>, transform_indices = @transform_1, window_bounds = array<i64: 64, 128>}, {pipeline_mode = #tpu.pipeline_mode<synchronous>, transform_indices = @transform_2, window_bounds = array<i64: 1, 128>}, {pipeline_mode = #tpu.pipeline_mode<synchronous>, transform_indices = @transform_3, window_bounds = array<i64: 128, 128>}, {pipeline_mode = #tpu.pipeline_mode<synchronous>, transform_indices = @transform_4, window_bounds = array<i64: 1, 128>}, {pipeline_mode = #tpu.pipeline_mode<synchronous>, transform_indices = @transform_5, window_bounds = array<i64: 128, 32>}, {pipeline_mode = #tpu.pipeline_mode<synchronous>, transform_indices = @transform_6, window_bounds = array<i64: 1, 32>}, {transform_indices = @transform_7, window_bounds = array<i64: 16, 32>}]} {
    %c0 = arith.constant 0 : index
    %c0_0 = arith.constant 0 : index
    %0 = vector.load %arg1[%c0, %c0_0] : memref<16x64xf32, #tpu.memory_space<vmem>>, vector<16x64xf32>
    %1 = arith.truncf %0 : vector<16x64xf32> to vector<16x64xbf16>
    %c0_1 = arith.constant 0 : index
    %c0_2 = arith.constant 0 : index
    %2 = vector.load %arg2[%c0_1, %c0_2] : memref<64x128xbf16, #tpu.memory_space<vmem>>, vector<64x128xbf16>
    %cst = arith.constant dense<0.000000e+00> : vector<16x128xf32>
    %3 = tpu.matmul %1, %2, %cst {dimension_numbers = #tpu.dot_dimension_numbers<[1], [0], [0], [1], [0, 0, 1, 1], [], []>} : vector<16x64xbf16>, vector<64x128xbf16>, vector<16x128xf32> -> vector<16x128xf32>
    %c0_3 = arith.constant 0 : index
    %c0_4 = arith.constant 0 : index
    %4 = vector.load %arg3[%c0_3, %c0_4] : memref<1x128xf32, #tpu.memory_space<vmem>>, vector<1x128xf32>
    %5 = vector.broadcast %4 : vector<1x128xf32> to vector<16x128xf32>
    %6 = arith.addf %3, %5 : vector<16x128xf32>
    %cst_5 = arith.constant 0.000000e+00 : f32
    %7 = vector.broadcast %cst_5 : f32 to vector<16x128xf32>
    %8 = arith.maximumf %6, %7 : vector<16x128xf32>
    %9 = arith.truncf %8 : vector<16x128xf32> to vector<16x128xbf16>
    %c0_6 = arith.constant 0 : index
    %c0_7 = arith.constant 0 : index
    %10 = vector.load %arg4[%c0_6, %c0_7] : memref<128x128xbf16, #tpu.memory_space<vmem>>, vector<128x128xbf16>
    %cst_8 = arith.constant dense<0.000000e+00> : vector<16x128xf32>
    %11 = tpu.matmul %9, %10, %cst_8 {dimension_numbers = #tpu.dot_dimension_numbers<[1], [0], [0], [1], [0, 0, 1, 1], [], []>} : vector<16x128xbf16>, vector<128x128xbf16>, vector<16x128xf32> -> vector<16x128xf32>
    %c0_9 = arith.constant 0 : index
    %c0_10 = arith.constant 0 : index
    %12 = vector.load %arg5[%c0_9, %c0_10] : memref<1x128xf32, #tpu.memory_space<vmem>>, vector<1x128xf32>
    %13 = vector.broadcast %12 : vector<1x128xf32> to vector<16x128xf32>
    %14 = arith.addf %11, %13 : vector<16x128xf32>
    %cst_11 = arith.constant 0.000000e+00 : f32
    %15 = vector.broadcast %cst_11 : f32 to vector<16x128xf32>
    %16 = arith.maximumf %14, %15 : vector<16x128xf32>
    %17 = arith.truncf %16 : vector<16x128xf32> to vector<16x128xbf16>
    %c0_12 = arith.constant 0 : index
    %c0_13 = arith.constant 0 : index
    %18 = vector.load %arg6[%c0_12, %c0_13] : memref<128x32xbf16, #tpu.memory_space<vmem>>, vector<128x32xbf16>
    %cst_14 = arith.constant dense<0.000000e+00> : vector<16x32xf32>
    %19 = tpu.matmul %17, %18, %cst_14 {dimension_numbers = #tpu.dot_dimension_numbers<[1], [0], [0], [1], [0, 0, 1, 1], [], []>} : vector<16x128xbf16>, vector<128x32xbf16>, vector<16x32xf32> -> vector<16x32xf32>
    %c0_15 = arith.constant 0 : index
    %c0_16 = arith.constant 0 : index
    %20 = vector.load %arg7[%c0_15, %c0_16] : memref<1x32xf32, #tpu.memory_space<vmem>>, vector<1x32xf32>
    %21 = vector.broadcast %20 : vector<1x32xf32> to vector<16x32xf32>
    %22 = arith.addf %19, %21 : vector<16x32xf32>
    %c0_17 = arith.constant 0 : index
    %c0_18 = arith.constant 0 : index
    %23 = vector.load %arg8[%c0_17, %c0_18] : memref<16x32xf32, #tpu.memory_space<vmem>>, vector<16x32xf32>
    tpu.vector_store %arg8[%c0_17, %c0_18], %22 {strides = array<i32>} : memref<16x32xf32, #tpu.memory_space<vmem>>, vector<16x32xf32>,
    return
  }
  func.func @transform_0(%arg0: i32) -> (i32, i32) {
    %c0_i32 = arith.constant 0 : i32
    %c0_i32_0 = arith.constant 0 : i32
    return %arg0, %c0_i32 : i32, i32
  }
  func.func @transform_1(%arg0: i32) -> (i32, i32) {
    %c0_i32 = arith.constant 0 : i32
    %c0_i32_0 = arith.constant 0 : i32
    %c0_i32_1 = arith.constant 0 : i32
    return %c0_i32, %c0_i32_0 : i32, i32
  }
  func.func @transform_2(%arg0: i32) -> (i32, i32) {
    %c0_i32 = arith.constant 0 : i32
    %c0_i32_0 = arith.constant 0 : i32
    %c0_i32_1 = arith.constant 0 : i32
    return %c0_i32, %c0_i32_0 : i32, i32
  }
  func.func @transform_3(%arg0: i32) -> (i32, i32) {
    %c0_i32 = arith.constant 0 : i32
    %c0_i32_0 = arith.constant 0 : i32
    %c0_i32_1 = arith.constant 0 : i32
    return %c0_i32, %c0_i32_0 : i32, i32
  }
  func.func @transform_4(%arg0: i32) -> (i32, i32) {
    %c0_i32 = arith.constant 0 : i32
    %c0_i32_0 = arith.constant 0 : i32
    %c0_i32_1 = arith.constant 0 : i32
    return %c0_i32, %c0_i32_0 : i32, i32
  }
  func.func @transform_5(%arg0: i32) -> (i32, i32) {
    %c0_i32 = arith.constant 0 : i32
    %c0_i32_0 = arith.constant 0 : i32
    %c0_i32_1 = arith.constant 0 : i32
    return %c0_i32, %c0_i32_0 : i32, i32
  }
  func.func @transform_6(%arg0: i32) -> (i32, i32) {
    %c0_i32 = arith.constant 0 : i32
    %c0_i32_0 = arith.constant 0 : i32
    %c0_i32_1 = arith.constant 0 : i32
    return %c0_i32, %c0_i32_0 : i32, i32
  }
  func.func @transform_7(%arg0: i32) -> (i32, i32) {
    %c0_i32 = arith.constant 0 : i32
    %c0_i32_0 = arith.constant 0 : i32
    return %arg0, %c0_i32 : i32, i32
  }
}

</mosaic_0001>

<bundles_post_ra>
// kernel: tpu_custom_call.1
= control target key start
LH: loop header
LB: loop body
LE: loop exit
PB: predicated region body
PF: predicated region fallthrough
CT: control target
= control target key end

     0   :  { %12 = vsyncpa [#allocation3], 0  ;;  %s570_s0 = inlined_call_operand.vmem [shape: f32[2,64], index: 0, kind: input, shape index: {}]   ;;  %s571_s1 = inlined_call_operand.hbm [shape: bf16[64,128], index: 1, kind: input, shape index: {}]   ;;  %s572_s2 = inlined_call_operand.vmem [shape: f32[1,128], index: 2, kind: input, shape index: {}]   ;;  %s573_s3 = inlined_call_operand.vmem [shape: bf16[128,128], index: 3, kind: input, shape index: {}]   ;;  %s574_s4 = inlined_call_operand.vmem [shape: f32[1,128], index: 4, kind: input, shape index: {}]   ;;  %s575_s5 = inlined_call_operand.vmem [shape: bf16[128,32], index: 5, kind: input, shape index: {}]   ;;  %s576_s6 = inlined_call_operand.vmem [shape: f32[1,32], index: 6, kind: input, shape index: {}]   ;;  %s577_s7 = inlined_call_operand.hbm [shape: f32[2,32], index: 7, kind: output, shape index: {}]  }
   0x1   :  { %13 = vsyncpa [#allocation4], 0  ;;  %s20_s26 = sshll.u32 %s571_s1, 4  ;;  %s455_s27 = smov [#allocation2]   ;;  %s21_s26 = int_to_ptr.hbm [resolvable:$true] %s20_s26 }
   0x2   :  { %s22_s28 = sshll.u32 %s455_s27, 4  ;;  %s456_s29 = smov 64   ;;  %s23_s28 = int_to_ptr.vmem [resolvable:$true] %s22_s28 }
   0x3   :  { %s457_s30 = smov 4  }
   0x4   :  { %28 = dma.hbm_to_vmem [thread:$0]  %s21_s26, 512, %s23_s28, [#allocation3], %s456_s29, %s456_s29, %s457_s30  }
   0x5   :  { %451 = dma.done.wait [#allocation3], 512  }
   0x6   :  { %452 = vsyncadd [#allocation3], 4294966784  ;;  %v377_v0 = vld [vmem:[#allocation2 + $0x18] sm:$0xff]  ;;  %v376_v1 = vld [vmem:[#allocation2 + $0x10] sm:$0xff]  ;;  %vm83_vm0 = vcmask 523264   ;;  %vm271_vm1 = vcmask 261120  }
   0x7   :  { %91 = vmatpush.bf16.msra.mxu0 %v377_v0  ;;  %v385_v2 = vld [vmem:[%s573_s3 + $0x38] sm:$0xff]  ;;  %v384_v3 = vld [vmem:[%s573_s3 + $0x30] sm:$0xff]  ;;  %v375_v4 = vld [vmem:[#allocation2 + $0x8] sm:$0xff] }
   0x8   :  { %172 = vmatpush.bf16.msra.mxu1 %v385_v2  ;;  %v383_v5 = vld [vmem:[%s573_s3 + $0x28] sm:$0xff]  ;;  %v374_v6 = vld [vmem:[#allocation2] sm:$0xff]  ;;  %v381_v11 = vld [vmem:[%s573_s3 + $0x18] sm:$0xff] }
   0x9   :  { %v44_v7 = vld [vmem:[%s570_s0] sm:$0xff]  ;;  %v45_v8 = vld [vmem:[%s570_s0 + $0x8] sm:$0xff]  ;;  %v380_v12 = vld [vmem:[%s573_s3 + $0x10] sm:$0xff] }
   0xa   :  { %v382_v9 = vld [vmem:[%s573_s3 + $0x20] sm:$0xff]  ;;  %v46_v10 = vpack.c.bf16 %v45_v8, %v44_v7  ;;  %v379_v13 = vld [vmem:[%s573_s3 + $0x8] sm:$0xff]  ;;  %v393_v15 = vld [vmem:[%s575_s5 + $0x38] sm:$0xff] }
   0xb   :  { %92 = vmatpush.bf16.msra.mxu0 %v376_v1  ;;  %v378_v14 = vld [vmem:[%s573_s3] sm:$0xff]  ;;  %257 = vmatpush.bf16.msra.mxu2 %v393_v15  ;;  %v392_v16 = vld [vmem:[%s575_s5 + $0x30] sm:$0xff]  ;;  %v391_v17 = vld [vmem:[%s575_s5 + $0x28] sm:$0xff] }
   0xc   :  { %173 = vmatpush.bf16.msra.mxu1 %v384_v3  ;;  %v390_v18 = vld [vmem:[%s575_s5 + $0x20] sm:$0xff]  ;;  %v389_v27 = vld [vmem:[%s575_s5 + $0x18] sm:$0xff]  ;;  %v388_v28 = vld [vmem:[%s575_s5 + $0x10] sm:$0xff] }
   0xd   :  { %v400_v20 = vld [vmem:[%s572_s2] ss:$0 sm:$0xff]  ;;  %v387_v29 = vld [vmem:[%s575_s5 + $0x8] sm:$0xff] }
   0xe   :  { %v386_v30 = vld [vmem:[%s575_s5] sm:$0xff] }
   0xf   :  { %93 = vmatpush.bf16.msra.mxu0 %v375_v4  ;;  %258 = vmatpush.bf16.msra.mxu2 %v392_v16  ;;  %v401_v32 = vld [vmem:[%s574_s4] ss:$0 sm:$0xff] }
  0x10   :  { %174 = vmatpush.bf16.msra.mxu1 %v383_v5  ;;  %v402_v39 = vld [vmem:[%s576_s6] ss:$0 sm:$0xff] }
  0x13   :  { %94 = vmatpush.bf16.msra.mxu0 %v374_v6  ;;  %259 = vmatpush.bf16.msra.mxu2 %v391_v17 }
  0x14   :  { %175 = vmatpush.bf16.msra.mxu1 %v382_v9 }
  0x16   :  { %309 = vmatmul.msk.bf16.vlgmr.msra.gmra.mxu0 %vm83_vm0, %v46_v10 }
  0x17   :  { %260 = vmatpush.bf16.msra.mxu2 %v390_v18 }
  0x18   :  { %176 = vmatpush.bf16.msra.mxu1 %v381_v11 }
  0x1b   :  { %261 = vmatpush.bf16.msra.mxu2 %v389_v27 }
  0x1c   :  { %177 = vmatpush.bf16.msra.mxu1 %v380_v12 }
  0x1f   :  { %262 = vmatpush.bf16.msra.mxu2 %v388_v28 }
  0x20   :  { %178 = vmatpush.bf16.msra.mxu1 %v379_v13 }
  0x23   :  { %263 = vmatpush.bf16.msra.mxu2 %v387_v29 }
  0x24   :  { %179 = vmatpush.bf16.msra.mxu1 %v378_v14 }
  0x27   :  { %264 = vmatpush.bf16.msra.mxu2 %v386_v30 }
  0x93   :  { %v96_v19 = vpop.f32.mrf.mxu0 }
  0x94   :  { %v97_v21 = vadd.f32 %v400_v20, %v96_v19 }
  0x96   :  { %v101_v24 = vmax.f32 %v97_v21, 0.0 }
  0x9b   :  { %v98_v22 = vpop.f32.mrf.mxu0 }
  0x9c   :  { %v99_v23 = vadd.f32 %v400_v20, %v98_v22 }
  0x9e   :  { %v102_v25 = vmax.f32 %v99_v23, 0.0 }
  0xa0   :  { %v103_v26 = vpack.c.bf16 %v102_v25, %v101_v24 }
  0xa2   :  { %180 = vmatmul.bf16.vlgmr.msra.gmra.mxu1 %v103_v26 }
 0x11f   :  { %v181_v31 = vpop.f32.mrf.mxu1 }
 0x120   :  { %v182_v33 = vadd.f32 %v401_v32, %v181_v31 }
 0x122   :  { %v186_v36 = vmax.f32 %v182_v33, 0.0 }
 0x127   :  { %v183_v34 = vpop.f32.mrf.mxu1 }
 0x128   :  { %v184_v35 = vadd.f32 %v401_v32, %v183_v34 }
 0x12a   :  { %v187_v37 = vmax.f32 %v184_v35, 0.0 }
 0x12c   :  { %v188_v38 = vpack.c.bf16 %v187_v37, %v186_v36 }
 0x12e   :  { %265 = vmatmul.bf16.vlgmr.msra.gmra.mxu2 %v188_v38 }
 0x1b1   :  { %v266_v40 = vpop.f32.mrf.mxu2 }
 0x1b2   :  { %v267_v41 = vadd.f32 %v402_v39, %v266_v40 }
 0x1b4   :  { %272 = vst.msk [vmem:[#allocation5] sm:$0xff] %vm271_vm1, %v267_v41 }
 0x1b9   :  { %v268_v42 = vpop.f32.mrf.mxu2 }
 0x1ba   :  { %v269_v43 = vadd.f32 %v402_v39, %v268_v42 }
 0x1bc   :  { %273 = vst.msk [vmem:[#allocation5 + $0x8] sm:$0xff] %vm271_vm1, %v269_v43 }
 0x1bd   :  { %277 = vsyncadd [#allocation4], 224  ;;  %s280_s22 = sshll.u32 %s577_s7, 4  ;;  %s458_s0 = smov [#allocation5]   ;;  %s281_s22 = int_to_ptr.hbm [resolvable:$true] %s280_s22 }
 0x1be   :  { %s278_s23 = sshll.u32 %s458_s0, 4  ;;  %s459_s24 = smov 32   ;;  %s279_s23 = int_to_ptr.vmem [resolvable:$true] %s278_s23 }
 0x1bf   :  { %s460_s25 = smov 2  }
 0x1c0   :  { %286 = dma.vmem_to_hbm [thread:$0]  %s279_s23, 32, %s281_s22, [#allocation4], %s459_s24, %s459_s24, %s460_s25  }
 0x1c1   :  { %453 = dma.done.wait [#allocation4], 256  }
 0x1c2   :  { %454 = vsyncadd [#allocation4], 4294967040 }
 0x1c3   :  { %291 = vsyncpa [#allocation3], 1 }
 0x1c4   :  { %292 = vsyncpa [#allocation4], 1 }

</bundles_post_ra>
